<compile_context>
chip_gen: v5e
topology: v5e:2x2
jax: 0.10.0
libtpu: 0.0.40
codegen_flags: <defaults>
</compile_context>

<pallas_src>
import jax
import jax.numpy as jnp
from jax.experimental import pallas as pl
from jax.experimental.pallas import tpu as pltpu

_LANES = 512  # lane-dense view width (multiple of 128) for divisible inputs


def _affine_kernel(bw_ref, x_ref, o_ref):
    # bw_ref: f32[2] scalar-prefetched (SMEM), [b, w]; x_ref/o_ref: (tile_m, N) VMEM.
    b = bw_ref[0]
    w = bw_ref[1]
    o_ref[...] = (b + w * x_ref[...].astype(jnp.float32)).astype(o_ref.dtype)


def _vmem_budget():
    """Generation-aware (per-buffer tile target bytes, vmem-limit cap bytes)."""
    try:
        cap = getattr(pltpu.get_tpu_info(), "vmem_capacity_bytes", None)
    except Exception:
        cap = None
    if cap is not None and cap >= 100 * 2**20:
        return 8 * 2**20, 64 * 2**20      # v5e / v6e: 128 MiB physical VMEM
    return 6 * 2**20, 40 * 2**20          # v7x (64 MiB per TC) or unknown


def manual_linear_regression(x, b, w):
    """y = b + w * x, elementwise.  x: any shape; b, w: scalar f32 params."""
    x = jnp.asarray(x)
    orig_shape = x.shape
    out_dtype = jnp.promote_types(x.dtype, jnp.float32)
    total = x.size

    if total == 0:
        return jnp.zeros(orig_shape, out_dtype)

    # Pick a 2-D view with metadata-only reshapes (no pad, no slice, no copy).
    if total % _LANES == 0:
        x2 = x.reshape(-1, _LANES)                 # lane-dense bulk path
    elif x.ndim >= 1:
        x2 = x.reshape(-1, orig_shape[-1])         # ragged path: mask edge block
    else:
        x2 = x.reshape(1, 1)                       # 0-d scalar input
    M, N = x2.shape

    target_tile_bytes, vmem_cap = _vmem_budget()
    in_item = jnp.dtype(x2.dtype).itemsize
    out_item = jnp.dtype(out_dtype).itemsize
    row_bytes = N * max(in_item, out_item)
    total_bytes = M * row_bytes

    # Row tile: multiple of 8 sublanes (or full extent), sized to the per-chip
    # budget; never a single block for >2 MiB inputs (keep both v7x TCs busy).
    rows = max(8, target_tile_bytes // max(row_bytes, 1))
    rows = max(8, (rows // 8) * 8)
    if rows >= M:
        if total_bytes > 2 * 2**20 and M >= 16:
            tile_m = min(M, ((pl.cdiv(M, 2) + 7) // 8) * 8)
        else:
            tile_m = M
    else:
        tile_m = rows
    grid_m = pl.cdiv(M, tile_m)

    # Explicit scoped-VMEM limit (v5e default of 16 MiB is too small for big
    # tiles); capped per generation so v7x keeps headroom under 64 MiB/TC.
    tile_bytes = tile_m * N * (in_item + out_item)
    vmem_limit = int(min(vmem_cap, max(32 * 2**20, 2 * tile_bytes + 8 * 2**20)))

    # Pack the two scalar parameters into one small scalar-prefetched array.
    bw = jnp.stack([
        jnp.asarray(b, jnp.float32).reshape(()),
        jnp.asarray(w, jnp.float32).reshape(()),
    ])

    y2 = pl.pallas_call(
        _affine_kernel,
        out_shape=jax.ShapeDtypeStruct((M, N), out_dtype),
        grid_spec=pltpu.PrefetchScalarGridSpec(
            num_scalar_prefetch=1,
            grid=(grid_m,),
            in_specs=[pl.BlockSpec((tile_m, N), lambda i, bw_ref: (i, 0))],
            out_specs=pl.BlockSpec((tile_m, N), lambda i, bw_ref: (i, 0)),
        ),
        compiler_params=pltpu.CompilerParams(
            dimension_semantics=("parallel",),
            vmem_limit_bytes=vmem_limit,
        ),
        cost_estimate=pl.CostEstimate(
            flops=2 * total,
            bytes_accessed=total * (in_item + out_item),
            transcendentals=0,
        ),
    )(bw, x2)

    return y2.reshape(orig_shape)


if __name__ == "__main__":
    key = jax.random.PRNGKey(0)
    kb, kw, kx, kodd = jax.random.split(key, 4)

    # Deterministic "parameters" (torch.randn(1) equivalents).
    b = jax.random.normal(kb, (1,), dtype=jnp.float32)
    w = jax.random.normal(kw, (1,), dtype=jnp.float32)

    # Small input consistent with an elementwise regression forward.
    x = jax.random.normal(kx, (128, 128), dtype=jnp.float32)
    y = jax.block_until_ready(manual_linear_regression(x, b, w))
    assert y.shape == x.shape and y.dtype == jnp.float32
    assert jnp.allclose(y, b[0] + w[0] * x, atol=1e-6, rtol=1e-6)

    # Ragged 2-D path (no pad / slice, masked edge block).
    x_odd = jax.random.normal(kodd, (5, 37), dtype=jnp.float32)
    y_odd = jax.block_until_ready(manual_linear_regression(x_odd, b, w))
    assert y_odd.shape == x_odd.shape
    assert jnp.allclose(y_odd, b[0] + w[0] * x_odd, atol=1e-6, rtol=1e-6)

    # Ragged 1-D path.
    x1d = jax.random.normal(kx, (1000,), dtype=jnp.float32)
    y1d = jax.block_until_ready(manual_linear_regression(x1d, b, w))
    assert y1d.shape == x1d.shape
    assert jnp.allclose(y1d, b[0] + w[0] * x1d, atol=1e-6, rtol=1e-6)

    print("KERNEL_OK")
</pallas_src>

<mosaic_0001>
module attributes {stable_mosaic.version = 11 : i64} {
  func.func @_affine_kernel(%arg0: i32, %arg1: memref<2xf32, #tpu.memory_space<smem>>, %arg2: memref<32x512xf32, #tpu.memory_space<vmem>>, %arg3: memref<32x512xf32, #tpu.memory_space<vmem>>) attributes {dimension_semantics = [#tpu.dimension_semantics<parallel>], iteration_bounds = array<i64: 1>, scalar_prefetch = 1 : i64, scratch_operands = 0 : i64, tpu.core_type = #tpu.core_type<tc>, window_params = [{transform_indices = @transform_0, window_bounds = array<i64: 32, 512>}, {transform_indices = @transform_1, window_bounds = array<i64: 32, 512>}]} {
    %c0 = arith.constant 0 : index
    %0 = memref.load %arg1[%c0] : memref<2xf32, #tpu.memory_space<smem>>
    %c1 = arith.constant 1 : index
    %1 = memref.load %arg1[%c1] : memref<2xf32, #tpu.memory_space<smem>>
    %c0_0 = arith.constant 0 : index
    %c0_1 = arith.constant 0 : index
    %2 = vector.load %arg2[%c0_0, %c0_1] : memref<32x512xf32, #tpu.memory_space<vmem>>, vector<32x512xf32>
    %3 = vector.broadcast %1 : f32 to vector<32x512xf32>
    %4 = arith.mulf %3, %2 : vector<32x512xf32>
    %5 = vector.broadcast %0 : f32 to vector<32x512xf32>
    %6 = arith.addf %5, %4 : vector<32x512xf32>
    %c0_2 = arith.constant 0 : index
    %c0_3 = arith.constant 0 : index
    %7 = vector.load %arg3[%c0_2, %c0_3] : memref<32x512xf32, #tpu.memory_space<vmem>>, vector<32x512xf32>
    tpu.vector_store %arg3[%c0_2, %c0_3], %6 {strides = array<i32>} : memref<32x512xf32, #tpu.memory_space<vmem>>, vector<32x512xf32>,
    return
  }
  func.func @transform_0(%arg0: i32, %arg1: memref<2xf32, #tpu.memory_space<smem>>) -> (i32, i32) {
    %c0_i32 = arith.constant 0 : i32
    %c0_i32_0 = arith.constant 0 : i32
    return %arg0, %c0_i32 : i32, i32
  }
  func.func @transform_1(%arg0: i32, %arg1: memref<2xf32, #tpu.memory_space<smem>>) -> (i32, i32) {
    %c0_i32 = arith.constant 0 : i32
    %c0_i32_0 = arith.constant 0 : i32
    return %arg0, %c0_i32 : i32, i32
  }
}

</mosaic_0001>

<bundles_post_ra>
// kernel: tpu_custom_call.1
= control target key start
LH: loop header
LB: loop body
LE: loop exit
PB: predicated region body
PF: predicated region fallthrough
CT: control target
= control target key end

     0   :  { %s193_s12 = smov [#allocation3]   ;;  %s228_s0 = inlined_call_operand.hbm [shape: f32[2], index: 0, kind: input, shape index: {}]   ;;  %s229_s1 = inlined_call_operand.hbm [shape: f32[32,512], index: 1, kind: input, shape index: {}]   ;;  %s230_s2 = inlined_call_operand.hbm [shape: f32[32,512], index: 2, kind: output, shape index: {}]  }
   0x1   :  { %s8_s11 = sshll.u32 %s228_s0, 4  ;;  %s9_s11 = int_to_ptr.hbm [resolvable:$true] %s8_s11 }
   0x2   :  { %11 = dma.hbm_to_smem %s9_s11, 16, %s193_s12, [#allocation2] }
   0x3   :  { %187 = dma.done.wait [#allocation2], 16 }
   0x4   :  { %188 = vsyncadd [#allocation2], 4294967280 }
   0x5   :  { %14 = sfence }
   0x6   :  { %15 = vsyncpa [#allocation5], 0 }
   0x7   :  { %16 = vsyncpa [#allocation6], 0  ;;  %s21_s15 = sshll.u32 %s229_s1, 4  ;;  %s194_s16 = smov [#allocation4]   ;;  %s22_s15 = int_to_ptr.hbm [resolvable:$true] %s21_s15 }
   0x8   :  { %s23_s17 = sshll.u32 %s194_s16, 4  ;;  %s195_s18 = smov 512   ;;  %s24_s17 = int_to_ptr.vmem [resolvable:$true] %s23_s17 }
   0x9   :  { %s196_s19 = smov 32  }
   0xa   :  { %29 = dma.hbm_to_vmem [thread:$0]  %s22_s15, 2048, %s24_s17, [#allocation5], %s195_s18, %s195_s18, %s196_s19  }
   0xb   :  { %189 = dma.done.wait [#allocation5], 2048  }
   0xc   :  { %190 = vsyncadd [#allocation5], 4294965248  ;;  %s34_s0 = sld [smem:[#allocation3]]  ;;  %v36_v0 = vld [vmem:[#allocation4] sm:$0xff]  ;;  %v37_v1 = vld [vmem:[#allocation4 + $0x8] sm:$0xff]  ;;  %s197_s1 = smov [#allocation7]  }
   0xd   :  { %s121_s20 = sld [smem:[#allocation3 + $0x1]]  ;;  %v38_v2 = vld [vmem:[#allocation4 + $0x10] sm:$0xff]  ;;  %v39_v5 = vld [vmem:[#allocation4 + $0x18] sm:$0xff]  ;;  %v40_v6 = vld [vmem:[#allocation4 + $0x20] sm:$0xff]  ;;  %s106_s21 = sshll.u32 %s197_s1, 4  ;;  %s107_s21 = int_to_ptr.vmem [resolvable:$true] %s106_s21 }
   0xe   :  { %v41_v7 = vld [vmem:[#allocation4 + $0x28] sm:$0xff]  ;;  %v42_v12 = vld [vmem:[#allocation4 + $0x30] sm:$0xff]  ;;  %v43_v13 = vld [vmem:[#allocation4 + $0x38] sm:$0xff]  ;;  %s108_s24 = sshll.u32 %s230_s2, 4  ;;  %s109_s24 = int_to_ptr.hbm [resolvable:$true] %s108_s24 }
   0xf   :  { %v44_v16 = vld [vmem:[#allocation4 + $0x40] sm:$0xff]  ;;  %v45_v21 = vld [vmem:[#allocation4 + $0x48] sm:$0xff]  ;;  %v46_v24 = vld [vmem:[#allocation4 + $0x50] sm:$0xff] }
  0x10   :  { %v47_v27 = vld [vmem:[#allocation4 + $0x58] sm:$0xff]  ;;  %v48_v30 = vld [vmem:[#allocation4 + $0x60] sm:$0xff]  ;;  %v49_v33 = vld [vmem:[#allocation4 + $0x68] sm:$0xff] }
  0x11   :  { %v50_v36 = vld [vmem:[#allocation4 + $0x70] sm:$0xff]  ;;  %v51_v39 = vld [vmem:[#allocation4 + $0x78] sm:$0xff] }
  0x12   :  { %v69_v4 = vstv %s34_s0 }
  0x13   :  { %v52_v3 = vstv %s121_s20 }
  0x14   :  { %v53_v8 = vmul.f32 %v52_v3, %v36_v0  ;;  %v54_v9 = vmul.f32 %v52_v3, %v37_v1  ;;  %v55_v10 = vmul.f32 %v52_v3, %v38_v2  ;;  %v56_v11 = vmul.f32 %v52_v3, %v39_v5 }
  0x15   :  { %v57_v14 = vmul.f32 %v52_v3, %v40_v6  ;;  %v58_v15 = vmul.f32 %v52_v3, %v41_v7  ;;  %v59_v20 = vmul.f32 %v52_v3, %v42_v12  ;;  %v60_v23 = vmul.f32 %v52_v3, %v43_v13 }
  0x16   :  { %v70_v17 = vadd.f32 %v69_v4, %v53_v8  ;;  %v71_v18 = vadd.f32 %v69_v4, %v54_v9  ;;  %v72_v19 = vadd.f32 %v69_v4, %v55_v10  ;;  %v73_v22 = vadd.f32 %v69_v4, %v56_v11 }
  0x17   :  { %v74_v25 = vadd.f32 %v69_v4, %v57_v14  ;;  %v61_v26 = vmul.f32 %v52_v3, %v44_v16  ;;  %v75_v28 = vadd.f32 %v69_v4, %v58_v15  ;;  %v62_v29 = vmul.f32 %v52_v3, %v45_v21 }
  0x18   :  { %86 = vst [vmem:[#allocation7] sm:$0xff] %v70_v17  ;;  %v76_v31 = vadd.f32 %v69_v4, %v59_v20  ;;  %v63_v32 = vmul.f32 %v52_v3, %v46_v24  ;;  %v77_v34 = vadd.f32 %v69_v4, %v60_v23  ;;  %v64_v35 = vmul.f32 %v52_v3, %v47_v27 }
  0x19   :  { %87 = vst [vmem:[#allocation7 + $0x8] sm:$0xff] %v71_v18  ;;  %v78_v37 = vadd.f32 %v69_v4, %v61_v26  ;;  %v65_v38 = vmul.f32 %v52_v3, %v48_v30  ;;  %v79_v40 = vadd.f32 %v69_v4, %v62_v29  ;;  %v66_v41 = vmul.f32 %v52_v3, %v49_v33 }
  0x1a   :  { %88 = vst [vmem:[#allocation7 + $0x10] sm:$0xff] %v72_v19  ;;  %v80_v42 = vadd.f32 %v69_v4, %v63_v32  ;;  %v67_v43 = vmul.f32 %v52_v3, %v50_v36  ;;  %v81_v44 = vadd.f32 %v69_v4, %v64_v35  ;;  %v68_v45 = vmul.f32 %v52_v3, %v51_v39 }
  0x1b   :  { %89 = vst [vmem:[#allocation7 + $0x18] sm:$0xff] %v73_v22  ;;  %v82_v46 = vadd.f32 %v69_v4, %v65_v38  ;;  %v83_v47 = vadd.f32 %v69_v4, %v66_v41 }
  0x1c   :  { %90 = vst [vmem:[#allocation7 + $0x20] sm:$0xff] %v74_v25  ;;  %v84_v48 = vadd.f32 %v69_v4, %v67_v43  ;;  %v85_v49 = vadd.f32 %v69_v4, %v68_v45 }
  0x1d   :  { %91 = vst [vmem:[#allocation7 + $0x28] sm:$0xff] %v75_v28 }
  0x1e   :  { %92 = vst [vmem:[#allocation7 + $0x30] sm:$0xff] %v76_v31 }
  0x1f   :  { %93 = vst [vmem:[#allocation7 + $0x38] sm:$0xff] %v77_v34 }
  0x20   :  { %94 = vst [vmem:[#allocation7 + $0x40] sm:$0xff] %v78_v37 }
  0x21   :  { %95 = vst [vmem:[#allocation7 + $0x48] sm:$0xff] %v79_v40 }
  0x22   :  { %96 = vst [vmem:[#allocation7 + $0x50] sm:$0xff] %v80_v42 }
  0x23   :  { %97 = vst [vmem:[#allocation7 + $0x58] sm:$0xff] %v81_v44 }
  0x24   :  { %98 = vst [vmem:[#allocation7 + $0x60] sm:$0xff] %v82_v46 }
  0x25   :  { %99 = vst [vmem:[#allocation7 + $0x68] sm:$0xff] %v83_v47 }
  0x26   :  { %100 = vst [vmem:[#allocation7 + $0x70] sm:$0xff] %v84_v48 }
  0x27   :  { %101 = vst [vmem:[#allocation7 + $0x78] sm:$0xff] %v85_v49 }
  0x28   :  { %114 = dma.vmem_to_hbm [thread:$0]  %s107_s21, 2048, %s109_s24, [#allocation6], %s195_s18, %s195_s18, %s196_s19  }
  0x29   :  { %191 = dma.done.wait [#allocation6], 2048  }
  0x2a   :  { %192 = vsyncadd [#allocation6], 4294965248 }
  0x2b   :  { %119 = vsyncpa [#allocation5], 1 }
  0x2c   :  { %120 = vsyncpa [#allocation6], 1 }

</bundles_post_ra>
